<compile_context>
chip_gen: v7x
topology: tpu7x:2x2x1
jax: 0.10.0
libtpu: 0.0.40
codegen_flags: <defaults>
</compile_context>

<pallas_src>
import functools

import jax
import jax.numpy as jnp
import numpy as np
from jax.experimental import pallas as pl
from jax.experimental.pallas import tpu as pltpu

_LANES = 128


def _phase_shuffle_kernel(shift_factor, true_t, t_pad, k_ref, x_ref, o_ref, *scratch):
    """One grid step: one (1, c_tile, T) slab of one batch element.

    shift_factor : static int, max |k|
    true_t       : static int, real time length T
    t_pad        : static int, T rounded up to a multiple of 128
    k_ref        : SMEM int32[B] (scalar prefetch: per-sample shifts)
    x_ref        : VMEM (1, c_tile, T) input block
    o_ref        : VMEM (1, c_tile, T) output block
    scratch      : optional VMEM (c_tile, t_pad) lane-padding buffer
                   (present iff T % 128 != 0)
    """
    W = _LANES
    b = pl.program_id(0)
    k = k_ref[b]                                  # int32 scalar, |k| <= shift_factor
    T = true_t

    if scratch:
        buf = scratch[0]
        buf[:, :T] = x_ref[0]                     # lane-pad once in VMEM (cheap);
        x = buf[...]                              # lanes >= T hold garbage but never
    else:                                         # leak into valid output lanes.
        x = x_ref[0]                              # (c_tile, t_pad) with t_pad == T

    # Bulk of the shift: one dynamic lane rotation (XLU):
    #   rolled[t] = x[(t - k) mod t_pad]
    # Already correct for every non-reflected output lane; the lanes that
    # wrapped around are exactly the <= |k| boundary lanes repaired below, and
    # lanes >= T are dropped by the masked output store.
    rolled = pltpu.roll(x, jnp.mod(k, t_pad), 1)

    # Reflected boundary values can be read back out of `rolled` itself:
    #   k > 0 : out[k - j]         = x[j]         = rolled[(k - j) + 2j]
    #   k < 0 : out[T - 1 + k + j] = x[T - 1 - j] = rolled[(T - 1 + k + j) - 2j]
    # for j = 1..|k|, i.e. a *static* lane shift of 2j per repair step.

    if t_pad == W or 3 * shift_factor > W:
        # Single window spans the whole (padded) tile; static-roll wrap-around
        # is mod t_pad and therefore consistent with `rolled`.
        lane = jax.lax.broadcasted_iota(jnp.int32, (1, t_pad), 1)
        out = rolled
        for j in range(1, shift_factor + 1):
            fwd = pltpu.roll(rolled, (-2 * j) % t_pad, 1)   # fwd[d] = rolled[d + 2j]
            bwd = pltpu.roll(rolled, (2 * j) % t_pad, 1)    # bwd[d] = rolled[d - 2j]
            out = jnp.where(lane == k - j, fwd, out)
            out = jnp.where(lane == T - 1 + k + j, bwd, out)
        o_ref[0] = out if t_pad == T else out[:, :T]
    else:
        # Bulk goes straight from `rolled`; the repair touches only two
        # 128-lane windows and is written back as shift_factor-wide slices.
        o_ref[0] = rolled if t_pad == T else rolled[:, :T]
        lane = jax.lax.broadcasted_iota(jnp.int32, (1, W), 1)

        # Head window (lanes [0, 128)): k > 0 reflection, dst lanes [0, k).
        head = rolled[:, :W]
        hfix = head
        for j in range(1, shift_factor + 1):
            fwd = pltpu.roll(head, (W - 2 * j) % W, 1)      # fwd[d] = head[d + 2j]
            hfix = jnp.where(lane == k - j, fwd, hfix)
        o_ref[0, :, 0:shift_factor] = hfix[:, 0:shift_factor]

        # Tail window (lanes [T-128, T)): k < 0 reflection, dst lanes [T-|k|, T).
        t0 = T - W
        tail = rolled[:, t0:T]
        tfix = tail
        for j in range(1, shift_factor + 1):
            bwd = pltpu.roll(tail, (2 * j) % W, 1)          # bwd[d] = tail[d - 2j]
            tfix = jnp.where(lane + t0 == T - 1 + k + j, bwd, tfix)
        o_ref[0, :, T - shift_factor:T] = tfix[:, W - shift_factor:W]


def _block_budget():
    """(target block bytes, explicit vmem_limit_bytes or None), per generation."""
    kind = ""
    try:
        kind = jax.devices()[0].device_kind.lower()
    except Exception:
        pass
    if "v7" in kind or "tpu7" in kind:
        return 8 << 20, 48 << 20          # 64 MiB physical VMEM, 3.2 TB/s HBM
    if "v6" in kind:
        return 4 << 20, None              # fits the 32 MiB default scoped VMEM
    return 2 << 20, None                  # v5e (16 MiB default scoped VMEM) / other


def phase_shuffle_pallas(x, k_per_sample, shift_factor):
    """x: (B, C, T); k_per_sample: int32 (B,) with values in [-shift, shift]."""
    B, C, T = x.shape
    if shift_factor == 0:
        return x
    if shift_factor > T - 1:
        raise ValueError("shift_factor must be <= T - 1 for reflect padding")
    k_per_sample = jnp.asarray(k_per_sample, jnp.int32)

    t_pad = -(-T // _LANES) * _LANES      # T rounded up to a lane multiple
    aligned = t_pad == T

    # Channel tiling: dtype-aware sublane multiple, sized so the
    # double-buffered in+out blocks stay within scoped VMEM on every generation.
    itemsize = jnp.dtype(x.dtype).itemsize
    sub = max(8, 32 // itemsize)          # 8 (f32), 16 (bf16), 32 (int8/fp8)
    target_bytes, vmem_limit = _block_budget()
    row_bytes = t_pad * itemsize
    if C <= sub:
        c_tile = C                        # block dim == full dim is always legal
    else:
        by_bytes = max(sub, (target_bytes // row_bytes) // sub * sub)
        c_tile = int(min((C // sub) * sub, by_bytes))
        # Keep at least 2 grid steps so both v7x TensorCores get work.
        while B * (-(-C // c_tile)) < 2 and c_tile > sub:
            c_tile = max(sub, (c_tile // 2) // sub * sub)
    grid = (B, -(-C // c_tile))           # ragged last channel tile is fine

    scratch_shapes = []
    if not aligned:
        # Lane-pad per block inside VMEM instead of jnp.pad/slice HBM passes.
        scratch_shapes.append(pltpu.VMEM((c_tile, t_pad), x.dtype))

    kernel = functools.partial(_phase_shuffle_kernel, shift_factor, T, t_pad)
    cp_kwargs = dict(dimension_semantics=("parallel", "parallel"))
    if vmem_limit is not None:
        cp_kwargs["vmem_limit_bytes"] = vmem_limit

    return pl.pallas_call(
        kernel,
        out_shape=jax.ShapeDtypeStruct((B, C, T), x.dtype),
        grid_spec=pltpu.PrefetchScalarGridSpec(
            num_scalar_prefetch=1,
            grid=grid,
            in_specs=[pl.BlockSpec((1, c_tile, T), lambda b, c, k: (b, c, 0))],
            out_specs=pl.BlockSpec((1, c_tile, T), lambda b, c, k: (b, c, 0)),
            scratch_shapes=scratch_shapes,
        ),
        compiler_params=pltpu.CompilerParams(**cp_kwargs),
    )(k_per_sample, x)


def phase_shuffle(x, key, shift_factor, batch_shuffle=False):
    """Functional equivalent of PhaseShuffle.forward (randomness via a JAX key)."""
    B = x.shape[0]
    if shift_factor == 0:
        return x, jnp.zeros((B,), jnp.int32)
    if batch_shuffle:
        k = jax.random.randint(key, (1,), -shift_factor, shift_factor + 1, jnp.int32)
        k_per_sample = jnp.broadcast_to(k, (B,))
    else:
        k_per_sample = jax.random.randint(
            key, (B,), -shift_factor, shift_factor + 1, jnp.int32
        )
    return phase_shuffle_pallas(x, k_per_sample, shift_factor), k_per_sample


def _reference(x, k_list):
    """Pure-numpy reference of the PyTorch semantics."""
    x = np.asarray(x)
    B, C, T = x.shape
    out = np.empty_like(x)
    for b in range(B):
        k = int(k_list[b])
        t = np.arange(T)
        s = t - k
        s = np.where(s < 0, -s, s)
        s = np.where(s > T - 1, 2 * (T - 1) - s, s)
        out[b] = x[b][:, s]
    return out


if __name__ == "__main__":
    shift_factor = 2
    root = jax.random.PRNGKey(0)
    keys = jax.random.split(root, 8)

    def check_explicit(key, shape, ks):
        x = jax.random.normal(key, shape, dtype=jnp.float32)
        ks = jnp.asarray(ks, jnp.int32)
        out = jax.block_until_ready(phase_shuffle_pallas(x, ks, shift_factor))
        np.testing.assert_array_equal(
            np.asarray(out), _reference(np.asarray(x), np.asarray(ks)))

    # 1) Small module-like shape (batch=2, channels=4, time=16): unaligned T
    #    -> in-VMEM lane padding + single-window repair.
    check_explicit(keys[0], (2, 4, 16), [2, -2])

    # 2) Lane-aligned T == 128: no scratch, single 128-lane window.
    check_explicit(keys[1], (2, 16, 128), [-1, 1])

    # 3) Lane-aligned T = 256 with ragged channel tiling (C=12 -> c_tile=8):
    #    bulk store from the roll + two-window boundary repair.
    check_explicit(keys[2], (2, 12, 256), [2, 0])

    # 4) Unaligned T = 200 (> 128): scratch padding + misaligned tail window.
    check_explicit(keys[3], (1, 8, 200), [-2])

    # 5) Random shifts through the functional wrapper (batch_shuffle=True).
    x5 = jax.random.normal(keys[4], (2, 4, 16), dtype=jnp.float32)
    out5, ks5 = phase_shuffle(x5, keys[5], shift_factor, batch_shuffle=True)
    out5 = jax.block_until_ready(out5)
    np.testing.assert_array_equal(
        np.asarray(out5), _reference(np.asarray(x5), np.asarray(ks5)))

    print("KERNEL_OK")
</pallas_src>

<mosaic_0001>
module attributes {stable_mosaic.version = 11 : i64} {
  func.func @_phase_shuffle_kernel(%arg0: i32, %arg1: i32, %arg2: memref<2xi32, #tpu.memory_space<smem>>, %arg3: memref<1x4x16xf32, #tpu.memory_space<vmem>>, %arg4: memref<1x4x16xf32, #tpu.memory_space<vmem>>, %arg5: memref<4x128xf32, #tpu.memory_space<vmem>>) attributes {dimension_semantics = [#tpu.dimension_semantics<parallel>, #tpu.dimension_semantics<parallel>], iteration_bounds = array<i64: 2, 1>, scalar_prefetch = 1 : i64, scratch_operands = 1 : i64, tpu.core_type = #tpu.core_type<tc>, window_params = [{transform_indices = @transform_0, window_bounds = array<i64: 1, 4, 16>}, {transform_indices = @transform_1, window_bounds = array<i64: 1, 4, 16>}]} {
    %0 = arith.index_cast %arg0 : i32 to index
    %1 = memref.load %arg2[%0] : memref<2xi32, #tpu.memory_space<smem>>
    %c0 = arith.constant 0 : index
    %c0_0 = arith.constant 0 : index
    %c0_1 = arith.constant 0 : index
    %2 = vector.load %arg3[%c0, %c0_0, %c0_1] : memref<1x4x16xf32, #tpu.memory_space<vmem>>, vector<1x4x16xf32>
    %3 = vector.shape_cast %2 : vector<1x4x16xf32> to vector<4x16xf32>
    %c0_2 = arith.constant 0 : index
    %c0_3 = arith.constant 0 : index
    %4 = vector.load %arg5[%c0_2, %c0_3] : memref<4x128xf32, #tpu.memory_space<vmem>>, vector<4x16xf32>
    tpu.vector_store %arg5[%c0_2, %c0_3], %3 {strides = array<i32>} : memref<4x128xf32, #tpu.memory_space<vmem>>, vector<4x16xf32>,
    %c0_4 = arith.constant 0 : index
    %c0_5 = arith.constant 0 : index
    %5 = vector.load %arg5[%c0_4, %c0_5] : memref<4x128xf32, #tpu.memory_space<vmem>>, vector<4x128xf32>
    %c128_i32 = arith.constant 128 : i32
    %c0_i32 = arith.constant 0 : i32
    %6 = arith.cmpi eq, %c128_i32, %c0_i32 : i32
    %c1_i32 = arith.constant 1 : i32
    %7 = arith.select %6, %c1_i32, %c128_i32 : i32
    %8 = arith.remsi %1, %7 : i32
    %c0_i32_6 = arith.constant 0 : i32
    %9 = arith.cmpi ne, %8, %c0_i32_6 : i32
    %c0_i32_7 = arith.constant 0 : i32
    %10 = arith.cmpi slt, %8, %c0_i32_7 : i32
    %c0_i32_8 = arith.constant 0 : i32
    %11 = arith.cmpi slt, %7, %c0_i32_8 : i32
    %12 = arith.xori %10, %11 : i1
    %13 = arith.andi %12, %9 : i1
    %14 = arith.addi %8, %7 : i32
    %15 = arith.select %13, %14, %8 : i32
    %16 = tpu.dynamic_rotate %5 by %15 dim 1 : vector<4x128xf32>, i32 -> vector<4x128xf32>
    %17 = tpu.iota {dimensions = array<i32: 1>} : vector<1x128xi32>
    %c126_i32 = arith.constant 126 : i32
    %18 = tpu.dynamic_rotate %16 by %c126_i32 dim 1 : vector<4x128xf32>, i32 -> vector<4x128xf32>
    %c2_i32 = arith.constant 2 : i32
    %19 = tpu.dynamic_rotate %16 by %c2_i32 dim 1 : vector<4x128xf32>, i32 -> vector<4x128xf32>
    %c1_i32_9 = arith.constant 1 : i32
    %20 = arith.subi %1, %c1_i32_9 : i32
    %21 = vector.broadcast %20 : i32 to vector<1x128xi32>
    %22 = arith.cmpi eq, %17, %21 : vector<1x128xi32>
    %23 = vector.shape_cast %22 : vector<1x128xi1> to vector<1x128xi1>
    %24 = vector.broadcast %23 : vector<1x128xi1> to vector<4x128xi1>
    %25 = arith.select %24, %18, %16 : vector<4x128xi1>, vector<4x128xf32>
    %c15_i32 = arith.constant 15 : i32
    %26 = arith.addi %c15_i32, %1 : i32
    %c1_i32_10 = arith.constant 1 : i32
    %27 = arith.addi %26, %c1_i32_10 : i32
    %28 = vector.broadcast %27 : i32 to vector<1x128xi32>
    %29 = arith.cmpi eq, %17, %28 : vector<1x128xi32>
    %30 = vector.shape_cast %29 : vector<1x128xi1> to vector<1x128xi1>
    %31 = vector.broadcast %30 : vector<1x128xi1> to vector<4x128xi1>
    %32 = arith.select %31, %19, %25 : vector<4x128xi1>, vector<4x128xf32>
    %c124_i32 = arith.constant 124 : i32
    %33 = tpu.dynamic_rotate %16 by %c124_i32 dim 1 : vector<4x128xf32>, i32 -> vector<4x128xf32>
    %c4_i32 = arith.constant 4 : i32
    %34 = tpu.dynamic_rotate %16 by %c4_i32 dim 1 : vector<4x128xf32>, i32 -> vector<4x128xf32>
    %c2_i32_11 = arith.constant 2 : i32
    %35 = arith.subi %1, %c2_i32_11 : i32
    %36 = vector.broadcast %35 : i32 to vector<1x128xi32>
    %37 = arith.cmpi eq, %17, %36 : vector<1x128xi32>
    %38 = vector.shape_cast %37 : vector<1x128xi1> to vector<1x128xi1>
    %39 = vector.broadcast %38 : vector<1x128xi1> to vector<4x128xi1>
    %40 = arith.select %39, %33, %32 : vector<4x128xi1>, vector<4x128xf32>
    %c15_i32_12 = arith.constant 15 : i32
    %41 = arith.addi %c15_i32_12, %1 : i32
    %c2_i32_13 = arith.constant 2 : i32
    %42 = arith.addi %41, %c2_i32_13 : i32
    %43 = vector.broadcast %42 : i32 to vector<1x128xi32>
    %44 = arith.cmpi eq, %17, %43 : vector<1x128xi32>
    %45 = vector.shape_cast %44 : vector<1x128xi1> to vector<1x128xi1>
    %46 = vector.broadcast %45 : vector<1x128xi1> to vector<4x128xi1>
    %47 = arith.select %46, %34, %40 : vector<4x128xi1>, vector<4x128xf32>
    %48 = vector.extract_strided_slice %47 {offsets = [0, 0], sizes = [4, 16], strides = [1, 1]} : vector<4x128xf32> to vector<4x16xf32>
    %c0_14 = arith.constant 0 : index
    %c0_15 = arith.constant 0 : index
    %c0_16 = arith.constant 0 : index
    %49 = vector.load %arg4[%c0_14, %c0_15, %c0_16] : memref<1x4x16xf32, #tpu.memory_space<vmem>>, vector<1x4x16xf32>
    %50 = vector.shape_cast %49 : vector<1x4x16xf32> to vector<4x16xf32>
    %51 = vector.shape_cast %48 : vector<4x16xf32> to vector<1x4x16xf32>
    tpu.vector_store %arg4[%c0_14, %c0_15, %c0_16], %51 {strides = array<i32>} : memref<1x4x16xf32, #tpu.memory_space<vmem>>, vector<1x4x16xf32>,
    return
  }
  func.func @transform_0(%arg0: i32, %arg1: i32, %arg2: memref<2xi32, #tpu.memory_space<smem>>) -> (i32, i32, i32) {
    %c0_i32 = arith.constant 0 : i32
    %c0_i32_0 = arith.constant 0 : i32
    return %arg0, %arg1, %c0_i32 : i32, i32, i32
  }
  func.func @transform_1(%arg0: i32, %arg1: i32, %arg2: memref<2xi32, #tpu.memory_space<smem>>) -> (i32, i32, i32) {
    %c0_i32 = arith.constant 0 : i32
    %c0_i32_0 = arith.constant 0 : i32
    return %arg0, %arg1, %c0_i32 : i32, i32, i32
  }
}

</mosaic_0001>

<bundles_post_ra>
// kernel: tpu_custom_call.1
= control target key start
LH: loop header
LB: loop body
LE: loop exit
PB: predicated region body
PF: predicated region fallthrough
CT: control target
= control target key end

     0   :  { %s738_s0 = inlined_call_operand.hbm [shape: s32[2], index: 0, kind: input, shape index: {}]   ;;  %s739_s1 = inlined_call_operand.hbm [shape: f32[2,4,16], index: 1, kind: input, shape index: {}]   ;;  %s740_s2 = inlined_call_operand.hbm [shape: f32[2,4,16], index: 2, kind: output, shape index: {}]  }
   0x1   :  { %s390_s11 = scalar_lea.hbm %s738_s0, 16 }
   0x2   :  { %p391_p0 = scmp.ne.s32.totalorder %s738_s0, %s390_s11  ;;  %p394_p1 = scmp.lt.u32.totalorder %s390_s11, %s738_s0 }
   0x4   :  { %p396_p2 = pnand %p394_p1, %p391_p0 }
   0x6   :  { %399 = shalt.err (!%p396_p2)  }
   0x7   :  { %s516_s16 = smov [#allocation4]  }
   0x8   :  { %8 = dma.hbm_to_smem %s738_s0, 16, %s516_s16, [#allocation3] }
   0x9   :  { %482 = dma.done.wait [#allocation3], 16 }
   0xa   :  { %483 = vsyncadd [#allocation3], 4294967280 }
   0xb   :  { %10 = sfence }
   0xc   :  { %11 = vsyncpa [#allocation6], 0 }
   0xd   :  { %13 = vsyncpa [#allocation6 + $0x1], 0 }
   0xe   :  { %14 = vsyncpa [#allocation7], 0 }
   0xf   :  { %16 = vsyncpa [#allocation7 + $0x1], 0  ;;  %s550_s19 = smov 0   ;;  %s552_s20 = smov 0  }
  0x10   :  { %s554_s21 = smov 0   ;;  %s556_s22 = smov 0  }
  0x11   :  { %s558_s23 = smov 0   ;;  %s560_s24 = smov 0  }
  0x12 LB: > { %s305_s0 = sadd.s32 4294967295, %s514_s24   ;;  %s306_s25 = sadd.s32 4294967294, %s514_s24   ;;  %s514_s24 = sphi %s560_s24, %s22_s24   ;;  %s510_s23 = sphi %s558_s23, %s756_s23   ;;  %s506_s22 = sphi %s556_s22, %s755_s22   ;;  %s502_s21 = sphi %s554_s21, %s754_s21   ;;  %s498_s20 = sphi %s552_s20, %s753_s20   ;;  %s494_s19 = sphi %s550_s19, %s752_s19  }
  0x13   : > { %s34_s26 = sadd.s32 1, %s510_s23  ;;  %s43_s27 = sadd.s32 1, %s502_s21 }
  0x14   : > { %p36_p3 = scmp.ge.s32.totalorder %s34_s26, 2  ;;  %p50_p4 = scmp.ne.s32.totalorder %s502_s21, %s498_s20 }
  0x15   : > { %p51_p5 = scmp.eq.s32.totalorder %s514_s24, 0  ;;  %p56_p6 = scmp.ne.s32.totalorder %s498_s20, %s494_s19 }
  0x16   : > { %s758_s26 = smov (%p36_p3, %s34_s26), 0  ;;  %p57_p8 = scmp.eq.s32.totalorder %s305_s0, 0 }
  0x17   : > { %p591_p7 = por %p51_p5, %p50_p4  ;;  %s38_s29 = ssub.s32 %s510_s23, %s758_s26 }
  0x18   : > { %p82_p9 = scmp.eq.s32.totalorder %s305_s0, 1  ;;  %p41_p10 = scmp.eq.s32.totalorder %s38_s29, 0 }
  0x19   : > { %p597_p11 = por %p57_p8, %p56_p6  ;;  %p88_p13 = scmp.eq.s32.totalorder %s306_s25, 1 }
  0x1a   : > { %p601_p12 = por %p82_p9, %p50_p4  ;;  %p335_p2 = scmp.lt.s32.totalorder %s514_s24, 2 }
  0x1b   : > { %s606_s4 = scalar_select %p41_p10, %s502_s21, %s43_s27  }
  0x1c   : > { %s744_s3 = scalar_select %p601_p12, 1, 0 }
  0x1d   : > { %p608_p0 = por %p88_p13, %p56_p6  ;;  %s108_s6 = sand.u32 1, %s502_s21  }
  0x1e   : > { %s309_s7 = sshll.u32 %s108_s6, 2  ;;  %s310_s8 = sshll.u32 %s510_s23, 6 }
  0x1f   : > { %s745_s5 = scalar_select %p608_p0, 1, 0 }
  0x20   : > { %s619_s11 = scalar_lea.hbm %s739_s1, %s310_s8  ;;  %s112_s12 = scalar_lea.vmem [#allocation5], %s309_s7 }
  0x21   : > { %s120_s13 = sshll.u32 %s112_s12, 4  ;;  %p625_p3 = pnand %p335_p2, %p591_p7  ;;  %s621_s13 = int_to_ptr.vmem [resolvable:$true] %s120_s13 }
  0x22   : > { %s109_s15 = scalar_lea.sflag [#allocation6], %s108_s6  ;;  %s400_s16 = scalar_lea.hbm %s619_s11, 64 }
  0x23   : > { %p401_p6 = scmp.ne.s32.totalorder %s619_s11, %s400_s16  ;;  %p402_p8 = pneg %p625_p3 }
  0x24   : > { %s405_s0 = scalar_lea.hbm %s739_s1, 128  ;;  %p406_p7 = scmp.lt.u32.totalorder %s619_s11, %s739_s1 }
  0x25   : > { %p403_p9 = pnand %p402_p8, %p401_p6  ;;  %p407_p13 = scmp.lt.u32.totalorder %s405_s0, %s400_s16 }
  0x26   : > { %p409_p1 = scmp.lt.u32.totalorder %s400_s16, %s619_s11 }
  0x27   : > { %p404_p10 = pneg %p403_p9  ;;  %p408_p2 = por %p407_p13, %p406_p7 }
  0x29   : > { %p410_p4 = por %p409_p1, %p408_p2 }
  0x2b   : > { %p411_p5 = pnand %p410_p4, %p404_p10 }
  0x2d   : > { %414 = shalt.err (!%p411_p5)
}
  0x2e   : > { %s415_s28 = scalar_lea.vmem %s621_s13, 64  ;;  %s517_s29 = smov [#allocation5]  }
  0x2f   : > { %p416_p6 = scmp.ne.s32.totalorder %s621_s13, %s415_s28  ;;  %s420_s6 = sshll.u32 %s517_s29, 4  ;;  %s421_s6 = int_to_ptr.vmem [resolvable:$false] %s420_s6 }
  0x30   : > { %s422_s7 = scalar_lea.vmem %s421_s6, 128  ;;  %p423_p12 = scmp.lt.s32.totalorder %s621_s13, %s421_s6 }
  0x31   : > { %p418_p9 = pnand %p416_p6, %p402_p8  ;;  %p424_p7 = scmp.lt.s32.totalorder %s422_s7, %s415_s28 }
  0x33   : > { %p419_p0 = pneg %p418_p9  ;;  %p425_p13 = por %p424_p7, %p423_p12 }
  0x35   : > { %p426_p1 = pnand %p425_p13, %p419_p0 }
  0x37   : > { %429 = shalt.err (!%p426_p1)
}
  0x38   : > { %330 = dma.hbm_to_vmem [thread:$0]  (!%p625_p3), %s619_s11, 64, %s621_s13, %s109_s15  }
  0x39   : > { %p747_p4 = scmp.lt.s32.totalorder %s514_s24, 3  ;;  %p748_p5 = scmp.ge.s32.totalorder %s514_s24, 1 }
  0x3b   : > { %p126_p8 = pnand %p748_p5, %p747_p4 }
  0x3c   : > { %s661_s8 = sand.u32 (!%p126_p8), 1, %s498_s20  }
  0x3d   : > { %129 = sbr.rel (%p126_p8) target bundleno = 334 (0x14e), region = 24  ;;  %s312_s9 = sshll.u32 (!%p126_p8), %s661_s8, 2 }
  0x3e   : > { %s132_s10 = scalar_lea.sflag (!%p126_p8), [#allocation6], %s661_s8  ;;  %s135_s12 = scalar_lea.vmem (!%p126_p8), [#allocation5], %s312_s9 }
  0x44   : > { %485 = dma.done.wait (%p597_p11), %s132_s10, 64  }
  0x45   : > { %487 = vsyncadd (%p597_p11), %s132_s10, 4294967232  ;;  %s672_s11 = sld [smem:[#allocation4 + %s506_s22]]  ;;  %vm156_vm0 = vcmask 125952   ;;  %v155_v0 = vld [vmem:[%s135_s12] sm:$0xf]  ;;  %s518_s18 = smov 2   ;;  %v175_v3 = vlaneseq }
  0x46   : > { %157 = vst.msk [vmem:[#allocation2] sm:$0xf] %vm156_vm0, %v155_v0  ;;  %s519_s0 = smov 126   ;;  %s520_s25 = smov 124  }
  0x47   : > { %s521_s27 = smov 4   ;;  %v176_v4 = vand.u32 127, %v175_v3  ;;  %s320_s10 = sshll.u32 %s506_s22, 6 }
  0x48   : > { %s153_s12 = scalar_lea.vmem [#allocation8], %s312_s9  ;;  %s211_s22 = scalar_lea.sflag [#allocation7], %s661_s8 }
  0x49   : > { %p749_p3 = scmp.ne.s32.totalorder %s744_s3, 0 }
  0x4b   : > { %p159_p12 = scmp.lt.s32.totalorder %s672_s11, 0  ;;  %s160_s13 = ssub.s32 0, %s672_s11 }
  0x4c   : > { %s314_s14 = smin.u32 %s160_s13, %s672_s11  ;;  %s317_s28 = sadd.s32 4294967295, %s672_s11 }
  0x4d   : > { %s162_s15 = sand.u32 127, %s314_s14   ;;  %v158_v1 = vld [vmem:[#allocation2] sm:$0xf]  ;;  %v182_v5 = vstv %s317_s28  ;;  %s187_s29 = sadd.s32 16, %s672_s11 }
  0x4e   : > { %s163_s16 = ssub.s32 0, %s162_s15  ;;  %s318_s6 = sadd.s32 4294967294, %s672_s11  ;;  %vm183_vm1 = vcmp.eq.s32.totalorder %v176_v4, %v182_v5  ;;  %v188_v6 = vstv %s187_s29 }
  0x4f   : > { %s760_s16 = smov (!%p159_p12, %s163_s16), %s162_s15  ;;  %s203_s7 = sadd.s32 17, %s672_s11  ;;  %v198_v7 = vstv %s318_s6  ;;  %vm189_vm2 = vcmp.eq.s32.totalorder %v176_v4, %v188_v6 }
  0x50   : > { %p316_p0 = scmp.lt.s32.totalorder %s760_s16, 0  ;;  %s169_s30 = sadd.s32 128, %s760_s16  ;;  %v204_v10 = vstv %s203_s7  ;;  %vm199_vm3 = vcmp.eq.s32.totalorder %v176_v4, %v198_v7 }
  0x51   : > { %s225_s13 = sshll.u32 %s153_s12, 4  ;;  %vm205_vm4 = vcmp.eq.s32.totalorder %v176_v4, %v204_v10  ;;  %s688_s15 = scalar_lea.hbm %s740_s2, %s320_s10  ;;  %s690_s13 = int_to_ptr.vmem [resolvable:$true] %s225_s13 }
  0x52   : > { %s762_s30 = smov (!%p316_p0, %s169_s30), %s760_s16  ;;  %s430_s9 = scalar_lea.vmem %s690_s13, 64 }
  0x53   : > { %s171_s17 = sand.u32 127, %s762_s30   ;;  %p431_p11 = scmp.ne.s32.totalorder %s690_s13, %s430_s9 }
  0x54   : > { %173 = vrot.lane.b32.xlu0 %v158_v1, %s171_s17  ;;  %s522_s16 = smov [#allocation8]  }
  0x55   : > { %p432_p10 = pnand %p431_p11, %p749_p3  ;;  %s434_s30 = sshll.u32 %s522_s16, 4  ;;  %s435_s30 = int_to_ptr.vmem [resolvable:$false] %s434_s30 }
  0x56   : > { %s436_s17 = scalar_lea.vmem %s435_s30, 128  ;;  %p437_p6 = scmp.lt.s32.totalorder %s690_s13, %s435_s30 }
  0x57   : > { %p433_p2 = pneg %p432_p10  ;;  %p438_p9 = scmp.lt.s32.totalorder %s436_s17, %s430_s9 }
  0x59   : > { %p439_p7 = por %p438_p9, %p437_p6 }
  0x5b   : > { %p440_p13 = pnand %p439_p7, %p433_p2 }
  0xc6   : > { %v174_v2 = vpop.permute.xlu0 %173 }
  0xc7   : > { %179 = vrot.lane.b32.xlu1 %v174_v2, %s518_s18  ;;  %177 = vrot.lane.b32.xlu0 %v174_v2, %s519_s0 }
  0xcb   : > { %193 = vrot.lane.b32.xlu1 %v174_v2, %s520_s25  ;;  %195 = vrot.lane.b32.xlu0 %v174_v2, %s521_s27 }
 0x139   : > { %v180_v8 = vpop.permute.xlu1 %179  ;;  %v178_v9 = vpop.permute.xlu0 %177 }
 0x13a   : > { %v186_v11 = vsel %vm183_vm1, %v178_v9, %v174_v2 }
 0x13b   : > { %v192_v13 = vsel %vm189_vm2, %v180_v8, %v186_v11 }
 0x13d   : > { %v194_v12 = vpop.permute.xlu1 %193  ;;  %v196_v14 = vpop.permute.xlu0 %195 }
 0x13e   : > { %v202_v15 = vsel %vm199_vm3, %v194_v12, %v192_v13 }
 0x13f   : > { %v208_v16 = vsel %vm205_vm4, %v196_v14, %v202_v15 }
 0x140   : > { %209 = vst.msk [vmem:[%s153_s12] sm:$0xf] %vm156_vm0, %v208_v16 }
 0x141   : > { %443 = shalt.err (!%p440_p13)
}
 0x142   : > { %s444_s8 = scalar_lea.hbm %s688_s15, 64  ;;  %s448_s25 = scalar_lea.hbm %s740_s2, 128 }
 0x143   : > { %p445_p1 = scmp.ne.s32.totalorder %s688_s15, %s444_s8  ;;  %p449_p8 = scmp.lt.u32.totalorder %s688_s15, %s740_s2 }
 0x144   : > { %p450_p12 = scmp.lt.u32.totalorder %s448_s25, %s444_s8  ;;  %p452_p11 = scmp.lt.u32.totalorder %s444_s8, %s688_s15 }
 0x145   : > { %p446_p4 = pnand %p445_p1, %p749_p3 }
 0x146   : > { %p451_p0 = por %p450_p12, %p449_p8 }
 0x147   : > { %p447_p5 = pneg %p446_p4 }
 0x148   : > { %p453_p10 = por %p452_p11, %p451_p0 }
 0x14a   : > { %p454_p2 = pnand %p453_p10, %p447_p5 }
 0x14c   : > { %457 = shalt.err (!%p454_p2)
}
 0x14d   : > { %325 = dma.vmem_to_hbm [thread:$0]  (%p749_p3), %s690_s13, 64, %s688_s15, %s211_s22  }
 0x14e PF: > { %s237_s29 = sand.u32 1, %s494_s19   ;;  %p750_p6 = scmp.ne.s32.totalorder %s745_s5, 0 }
 0x14f   : > { %p751_p9 = scmp.ge.s32.totalorder %s514_s24, 2  ;;  %s238_s6 = scalar_lea.sflag [#allocation7], %s237_s29 }
 0x151   : > { %p332_p7 = pnand %p751_p9, %p750_p6 }
 0x153   : > { %489 = dma.done.wait (!%p332_p7), %s238_s6, 64  }
 0x154   : > { %491 = vsyncadd (!%p332_p7), %s238_s6, 4294967232  ;;  %s22_s24 = sadd.s32 1, %s514_s24   ;;  %s752_s19 = smov %s498_s20 }
 0x155   : > { %p19_p13 = scmp.ge.s32.totalorder %s22_s24, 4   ;;  %s753_s20 = smov %s502_s21 }
 0x156   : > { %s754_s21 = smov %s606_s4  ;;  %s755_s22 = smov %s510_s23 }
 0x157   : > { %s756_s23 = smov %s758_s26  ;;  %21 = sbr.rel (!%p19_p13) target bundleno = 18 (0x12), region = 69 }
 0x15e   :  { %243 = vsyncpa [#allocation6], 1 }
 0x15f   :  { %245 = vsyncpa [#allocation6 + $0x1], 1 }
 0x160   :  { %246 = vsyncpa [#allocation7], 1 }
 0x161   :  { %248 = vsyncpa [#allocation7 + $0x1], 1 }

</bundles_post_ra>
